<compile_context>
chip_gen: v5e
topology: v5e:2x2
jax: 0.10.0
libtpu: 0.0.40
codegen_flags: <defaults>
</compile_context>

<pallas_src>
import jax
import jax.numpy as jnp
from jax.experimental import pallas as pl
from jax.experimental.pallas import tpu as pltpu


_TARGET_BLOCK_BYTES = 4 * 1024 * 1024   # ~4 MiB per block


def _sigmoid_kernel(x_ref, o_ref):
    # Upcast in-register; numerically-stable sigmoid via a single tanh
    # (one EUP transcendental per element).
    p = x_ref[...].astype(jnp.float32)
    s = 0.5 * (jnp.tanh(0.5 * p) + 1.0)
    o_ref[...] = s.astype(o_ref.dtype)


def sigmoid_native_2d(x2d):
    """Elementwise sigmoid over a 2-D array kept in its native layout.

    The last dim (H*W for YOLO heads) is the lane axis; rows are tiled in
    multiples of 8 targeting ~4 MiB/block.  Blocks that do not evenly divide
    the row count are handled by Pallas' boundary masking; if the row count
    is smaller than one tile, a single full-array block is used (always a
    legal block shape).
    """
    n, m = x2d.shape
    dt = x2d.dtype
    row_bytes = m * dt.itemsize
    tile_n = (_TARGET_BLOCK_BYTES // max(row_bytes, 1)) // 8 * 8
    tile_n = max(8, tile_n)
    tile_n = min(tile_n, n)   # if clamped here, block == full row extent

    return pl.pallas_call(
        _sigmoid_kernel,
        grid=(pl.cdiv(n, tile_n),),
        in_specs=[pl.BlockSpec((tile_n, m), lambda i: (i, 0))],
        out_specs=pl.BlockSpec((tile_n, m), lambda i: (i, 0)),
        out_shape=jax.ShapeDtypeStruct((n, m), dt),
        input_output_aliases={0: 0},
        compiler_params=pltpu.CompilerParams(
            dimension_semantics=("parallel",),
            vmem_limit_bytes=48 * 1024 * 1024),
    )(x2d)


class YOLOLossJax:
    """JAX/Pallas port of the (truncated) YOLOLoss.forward."""

    def __init__(self, anchors, num_classes, input_shape,
                 anchors_mask=((6, 7, 8), (3, 4, 5), (0, 1, 2)),
                 label_smoothing=0):
        self.anchors = anchors
        self.num_classes = num_classes
        self.bbox_attrs = 5 + num_classes
        self.input_shape = input_shape
        self.anchors_mask = anchors_mask
        self.label_smoothing = label_smoothing
        self.threshold = 4
        self.balance = [0.4, 1.0, 4]
        self.box_ratio = 0.05
        self.obj_ratio = 1 * (input_shape[0] + input_shape[1]) / 640 ** 2
        self.cls_ratio = 0.5 * (num_classes / 80)

    def forward(self, l, x_in, targets=None, y_true=None):
        bs, _, in_h, in_w = x_in.shape
        stride_h = self.input_shape[0] / in_h
        stride_w = self.input_shape[1] / in_w
        # scaled anchors (kept for fidelity with the torch code; unused in
        # the truncated forward)
        _scaled_anchors = [(a_w / stride_w, a_h / stride_h)
                           for a_w, a_h in self.anchors]
        na = len(self.anchors_mask[l])
        A = self.bbox_attrs

        # 1. sigmoid on the NATIVE layout via the Pallas kernel:
        #    (bs*na*A, H*W) -> lane-dense rows, zero data reorder.
        sig2d = sigmoid_native_2d(x_in.reshape(bs * na * A, in_h * in_w))
        sig = sig2d.reshape(bs, na, A, in_h, in_w)

        # 2. channel decode by slicing along the A axis of the native view;
        #    each slice is already (bs, na, H, W) — no whole-tensor
        #    channels-last transpose.
        x = sig[:, :, 0]
        y = sig[:, :, 1]
        w = sig[:, :, 2]
        h = sig[:, :, 3]
        conf = sig[:, :, 4]
        # Only the class channels get reordered to keep the PyTorch
        # (bs, na, H, W, nc) convention.
        pred_cls = jnp.moveaxis(sig[:, :, 5:], 2, -1)

        # 3. data-independent grids built in the wrapper (fused iota; no HBM
        #    writeback from the kernel).
        grid_x = jnp.broadcast_to(
            jnp.arange(in_w, dtype=x.dtype)[None, None, None, :],
            (bs, na, in_h, in_w))
        grid_y = jnp.broadcast_to(
            jnp.arange(in_h, dtype=x.dtype)[None, None, :, None],
            (bs, na, in_h, in_w))

        # The torch forward prints grid_y.shape and returns None; we return
        # the decoded tensors so the caller can verify the kernel output.
        # TODO(synk): the torch forward body is truncated after the grid
        # build; the remainder of the loss has no reference to port.
        return x, y, w, h, conf, pred_cls, grid_x, grid_y


if __name__ == "__main__":
    # deterministic synthetic setup
    num_classes = 4
    input_shape = (128, 128)
    anchors = [(10, 13), (16, 30), (33, 23),
               (30, 61), (62, 45), (59, 119),
               (116, 90), (156, 198), (373, 326)]
    loss_mod = YOLOLossJax(anchors, num_classes, input_shape)

    bs, in_h, in_w = 2, 16, 16
    na = 3
    A = 5 + num_classes  # 9
    key = jax.random.PRNGKey(0)
    x_in = jax.random.normal(key, (bs, na * A, in_h, in_w), dtype=jnp.float32)

    outs = jax.block_until_ready(loss_mod.forward(0, x_in))
    x, y, w, h, conf, pred_cls, grid_x, grid_y = outs

    # reference check against plain-JAX decode
    pred_ref = jnp.transpose(x_in.reshape(bs, na, A, in_h, in_w),
                             (0, 1, 3, 4, 2))
    sig_ref = jax.nn.sigmoid(pred_ref)
    gx_ref = jnp.broadcast_to(
        jnp.arange(in_w, dtype=jnp.float32)[None, None, None, :],
        (bs, na, in_h, in_w))
    gy_ref = jnp.broadcast_to(
        jnp.arange(in_h, dtype=jnp.float32)[None, None, :, None],
        (bs, na, in_h, in_w))

    TOL = 1e-5   # exact sigmoid (tanh form); only float rounding differences
    assert x.shape == (bs, na, in_h, in_w)
    assert pred_cls.shape == (bs, na, in_h, in_w, num_classes)
    assert jnp.allclose(x, sig_ref[..., 0], atol=TOL)
    assert jnp.allclose(y, sig_ref[..., 1], atol=TOL)
    assert jnp.allclose(w, sig_ref[..., 2], atol=TOL)
    assert jnp.allclose(h, sig_ref[..., 3], atol=TOL)
    assert jnp.allclose(conf, sig_ref[..., 4], atol=TOL)
    assert jnp.allclose(pred_cls, sig_ref[..., 5:], atol=TOL)
    assert jnp.allclose(grid_x, gx_ref)
    assert jnp.allclose(grid_y, gy_ref)
    assert grid_y.shape == (bs, na, in_h, in_w)

    print("KERNEL_OK")
</pallas_src>

<mosaic_0001>
module attributes {stable_mosaic.version = 11 : i64} {
  func.func @_sigmoid_kernel(%arg0: i32, %arg1: memref<54x256xf32, #tpu.memory_space<vmem>>, %arg2: memref<54x256xf32, #tpu.memory_space<vmem>>) attributes {dimension_semantics = [#tpu.dimension_semantics<parallel>], iteration_bounds = array<i64: 1>, scalar_prefetch = 0 : i64, scratch_operands = 0 : i64, tpu.core_type = #tpu.core_type<tc>, window_params = [{transform_indices = @transform_0, window_bounds = array<i64: 54, 256>}, {transform_indices = @transform_1, window_bounds = array<i64: 54, 256>}]} {
    %c0 = arith.constant 0 : index
    %c0_0 = arith.constant 0 : index
    %0 = vector.load %arg1[%c0, %c0_0] : memref<54x256xf32, #tpu.memory_space<vmem>>, vector<54x256xf32>
    %cst = arith.constant 5.000000e-01 : f32
    %1 = vector.broadcast %cst : f32 to vector<54x256xf32>
    %2 = arith.mulf %1, %0 : vector<54x256xf32>
    %3 = math.tanh %2 : vector<54x256xf32>
    %cst_1 = arith.constant 1.000000e+00 : f32
    %4 = vector.broadcast %cst_1 : f32 to vector<54x256xf32>
    %5 = arith.addf %3, %4 : vector<54x256xf32>
    %cst_2 = arith.constant 5.000000e-01 : f32
    %6 = vector.broadcast %cst_2 : f32 to vector<54x256xf32>
    %7 = arith.mulf %6, %5 : vector<54x256xf32>
    %c0_3 = arith.constant 0 : index
    %c0_4 = arith.constant 0 : index
    %8 = vector.load %arg2[%c0_3, %c0_4] : memref<54x256xf32, #tpu.memory_space<vmem>>, vector<54x256xf32>
    tpu.vector_store %arg2[%c0_3, %c0_4], %7 {strides = array<i32>} : memref<54x256xf32, #tpu.memory_space<vmem>>, vector<54x256xf32>,
    return
  }
  func.func @transform_0(%arg0: i32) -> (i32, i32) {
    %c0_i32 = arith.constant 0 : i32
    %c0_i32_0 = arith.constant 0 : i32
    return %arg0, %c0_i32 : i32, i32
  }
  func.func @transform_1(%arg0: i32) -> (i32, i32) {
    %c0_i32 = arith.constant 0 : i32
    %c0_i32_0 = arith.constant 0 : i32
    return %arg0, %c0_i32 : i32, i32
  }
}

</mosaic_0001>

<bundles_post_ra>
// kernel: tpu_custom_call.1
= control target key start
LH: loop header
LB: loop body
LE: loop exit
PB: predicated region body
PF: predicated region fallthrough
CT: control target
= control target key end

     0   :  { %6 = vsyncpa [#allocation3], 0  ;;  %s238_s0 = inlined_call_operand.hbm [shape: f32[54,256], index: 0, kind: input, shape index: {}, may-alias: {0,1}]   ;;  %s239_s1 = inlined_call_operand.hbm [shape: f32[54,256], index: 1, kind: output, shape index: {}, may-alias: {0,1}]  }
   0x1   :  { %7 = vsyncpa [#allocation4], 0  ;;  %s12_s8 = sshll.u32 %s238_s0, 4  ;;  %s212_s9 = smov [#allocation2]   ;;  %s13_s8 = int_to_ptr.hbm [resolvable:$true] %s12_s8 }
   0x2   :  { %s14_s10 = sshll.u32 %s212_s9, 4  ;;  %s213_s11 = smov 256   ;;  %s15_s10 = int_to_ptr.vmem [resolvable:$true] %s14_s10 }
   0x3   :  { %s214_s12 = smov 16  }
   0x4   :  { %20 = dma.hbm_to_vmem [thread:$0]  %s13_s8, 1792, %s15_s10, [#allocation3], %s213_s11, %s213_s11, %s214_s12  }
   0x5   :  { %208 = dma.done.wait [#allocation3], 1792  }
   0x6   :  { %209 = vsyncadd [#allocation3], 4294965504  ;;  %v25_v0 = vld [vmem:[#allocation2] sm:$0xff]  ;;  %v26_v1 = vld [vmem:[#allocation2 + $0x8] sm:$0xff]  ;;  %s215_s0 = smov [#allocation5]   ;;  %s115_s16 = sshll.u32 %s239_s1, 4  ;;  %s116_s16 = int_to_ptr.hbm [resolvable:$true] %s115_s16 }
   0x7   :  { %v27_v2 = vld [vmem:[#allocation2 + $0x10] sm:$0xff]  ;;  %v39_v3 = vmul.f32 0.5, %v25_v0  ;;  %v40_v4 = vmul.f32 0.5, %v26_v1  ;;  %v28_v6 = vld [vmem:[#allocation2 + $0x18] sm:$0xff]  ;;  %v29_v7 = vld [vmem:[#allocation2 + $0x20] sm:$0xff]  ;;  %s113_s13 = sshll.u32 %s215_s0, 4  ;;  %s114_s13 = int_to_ptr.vmem [resolvable:$true] %s113_s13 }
   0x8   :  { %v41_v5 = vmul.f32 0.5, %v27_v2  ;;  %v30_v8 = vld [vmem:[#allocation2 + $0x28] sm:$0xff]  ;;  %v42_v9 = vmul.f32 0.5, %v28_v6  ;;  %v31_v10 = vld [vmem:[#allocation2 + $0x30] sm:$0xff]  ;;  %v43_v11 = vmul.f32 0.5, %v29_v7  ;;  %v32_v12 = vld [vmem:[#allocation2 + $0x38] sm:$0xff] }
   0x9   :  { %132 = vtanh.f32 %v39_v3  ;;  %v44_v13 = vmul.f32 0.5, %v30_v8  ;;  %v33_v14 = vld [vmem:[#allocation2 + $0x40] sm:$0xff]  ;;  %v45_v15 = vmul.f32 0.5, %v31_v10  ;;  %v34_v16 = vld [vmem:[#allocation2 + $0x48] sm:$0xff]  ;;  %v46_v17 = vmul.f32 0.5, %v32_v12  ;;  %v35_v18 = vld [vmem:[#allocation2 + $0x50] sm:$0xff] }
   0xa   :  { %134 = vtanh.f32 %v40_v4  ;;  %v47_v19 = vmul.f32 0.5, %v33_v14  ;;  %v36_v20 = vld [vmem:[#allocation2 + $0x58] sm:$0xff]  ;;  %v48_v21 = vmul.f32 0.5, %v34_v16  ;;  %v37_v22 = vld [vmem:[#allocation2 + $0x60] sm:$0x3f]  ;;  %v49_v24 = vmul.f32 0.5, %v35_v18 }
   0xb   :  { %136 = vtanh.f32 %v41_v5  ;;  %v38_v25 = vld [vmem:[#allocation2 + $0x68] sm:$0x3f]  ;;  %v50_v28 = vmul.f32 0.5, %v36_v20  ;;  %v51_v31 = vmul.f32 0.5, %v37_v22 }
   0xc   :  { %138 = vtanh.f32 %v42_v9  ;;  %v52_v35 = vmul.f32 0.5, %v38_v25 }
   0xd   :  { %140 = vtanh.f32 %v43_v11 }
   0xe   :  { %142 = vtanh.f32 %v44_v13 }
   0xf   :  { %v133_v23 = vpop.eup %132  ;;  %144 = vtanh.f32 %v45_v15 }
  0x10   :  { %v135_v26 = vpop.eup %134  ;;  %v67_v27 = vadd.f32 1.0, %v133_v23  ;;  %146 = vtanh.f32 %v46_v17 }
  0x11   :  { %v137_v29 = vpop.eup %136  ;;  %v68_v30 = vadd.f32 1.0, %v135_v26  ;;  %148 = vtanh.f32 %v47_v19 }
  0x12   :  { %v139_v32 = vpop.eup %138  ;;  %v81_v33 = vmul.f32 0.5, %v67_v27  ;;  %v69_v34 = vadd.f32 1.0, %v137_v29  ;;  %150 = vtanh.f32 %v48_v21 }
  0x13   :  { %v141_v36 = vpop.eup %140  ;;  %v82_v37 = vmul.f32 0.5, %v68_v30  ;;  %v70_v38 = vadd.f32 1.0, %v139_v32  ;;  %152 = vtanh.f32 %v49_v24 }
  0x14   :  { %v143_v39 = vpop.eup %142  ;;  %95 = vst [vmem:[#allocation5] sm:$0xff] %v81_v33  ;;  %v83_v40 = vmul.f32 0.5, %v69_v34  ;;  %v71_v41 = vadd.f32 1.0, %v141_v36  ;;  %154 = vtanh.f32 %v50_v28 }
  0x15   :  { %v145_v42 = vpop.eup %144  ;;  %96 = vst [vmem:[#allocation5 + $0x8] sm:$0xff] %v82_v37  ;;  %v84_v43 = vmul.f32 0.5, %v70_v38  ;;  %v72_v44 = vadd.f32 1.0, %v143_v39  ;;  %156 = vtanh.f32 %v51_v31 }
  0x16   :  { %v147_v45 = vpop.eup %146  ;;  %97 = vst [vmem:[#allocation5 + $0x10] sm:$0xff] %v83_v40  ;;  %v85_v46 = vmul.f32 0.5, %v71_v41  ;;  %v73_v47 = vadd.f32 1.0, %v145_v42  ;;  %158 = vtanh.f32 %v52_v35 }
  0x17   :  { %v149_v48 = vpop.eup %148  ;;  %98 = vst [vmem:[#allocation5 + $0x18] sm:$0xff] %v84_v43  ;;  %v86_v49 = vmul.f32 0.5, %v72_v44  ;;  %v74_v50 = vadd.f32 1.0, %v147_v45 }
  0x18   :  { %v151_v51 = vpop.eup %150  ;;  %99 = vst [vmem:[#allocation5 + $0x20] sm:$0xff] %v85_v46  ;;  %v87_v52 = vmul.f32 0.5, %v73_v47  ;;  %v75_v53 = vadd.f32 1.0, %v149_v48 }
  0x19   :  { %v153_v54 = vpop.eup %152  ;;  %100 = vst [vmem:[#allocation5 + $0x28] sm:$0xff] %v86_v49  ;;  %v88_v55 = vmul.f32 0.5, %v74_v50  ;;  %v76_v56 = vadd.f32 1.0, %v151_v51 }
  0x1a   :  { %v155_v57 = vpop.eup %154  ;;  %101 = vst [vmem:[#allocation5 + $0x30] sm:$0xff] %v87_v52  ;;  %v89_v58 = vmul.f32 0.5, %v75_v53  ;;  %v77_v59 = vadd.f32 1.0, %v153_v54 }
  0x1b   :  { %v157_v60 = vpop.eup %156  ;;  %102 = vst [vmem:[#allocation5 + $0x38] sm:$0xff] %v88_v55  ;;  %v90_v61 = vmul.f32 0.5, %v76_v56  ;;  %v78_v62 = vadd.f32 1.0, %v155_v57 }
  0x1c   :  { %v159_v63 = vpop.eup %158  ;;  %103 = vst [vmem:[#allocation5 + $0x40] sm:$0xff] %v89_v58  ;;  %v91_v0 = vmul.f32 0.5, %v77_v59  ;;  %v79_v1 = vadd.f32 1.0, %v157_v60 }
  0x1d   :  { %104 = vst [vmem:[#allocation5 + $0x48] sm:$0xff] %v90_v61  ;;  %v92_v2 = vmul.f32 0.5, %v78_v62  ;;  %v80_v3 = vadd.f32 1.0, %v159_v63 }
  0x1e   :  { %105 = vst [vmem:[#allocation5 + $0x50] sm:$0xff] %v91_v0  ;;  %v93_v4 = vmul.f32 0.5, %v79_v1 }
  0x1f   :  { %106 = vst [vmem:[#allocation5 + $0x58] sm:$0xff] %v92_v2  ;;  %v94_v5 = vmul.f32 0.5, %v80_v3 }
  0x20   :  { %107 = vst [vmem:[#allocation5 + $0x60] sm:$0x3f] %v93_v4 }
  0x21   :  { %108 = vst [vmem:[#allocation5 + $0x68] sm:$0x3f] %v94_v5 }
  0x22   :  { %121 = dma.vmem_to_hbm [thread:$0]  %s114_s13, 1792, %s116_s16, [#allocation4], %s213_s11, %s213_s11, %s214_s12  }
  0x23   :  { %210 = dma.done.wait [#allocation4], 1792  }
  0x24   :  { %211 = vsyncadd [#allocation4], 4294965504 }
  0x25   :  { %126 = vsyncpa [#allocation3], 1 }
  0x26   :  { %127 = vsyncpa [#allocation4], 1 }

</bundles_post_ra>
